<compile_context>
chip_gen: v7x
topology: tpu7x:2x2x1
jax: 0.10.0
libtpu: 0.0.40
codegen_flags: <defaults>
</compile_context>

<pallas_src>
import functools
import math

import jax
import jax.numpy as jnp
from jax.experimental import pallas as pl
from jax.experimental.pallas import tpu as pltpu


_TM_CAP = 512                 # rows per output tile
_TN_CAP = 512                 # output lanes per tile (multiple of 256 when N allows)
_TK_CAP = 1024                # reduction tile; <= this -> single-K fast path
_VMEM_LIMIT_BYTES = 40 * 1024 * 1024


def _round_up(v, m):
    return ((v + m - 1) // m) * m


def _sublane_min(dtype):
    # Native sublane packing: f32 -> 8, bf16 -> 16, int8/fp8 -> 32.
    return {4: 8, 2: 16, 1: 32}[jnp.dtype(dtype).itemsize]


def _pick_tn(Np, want_two_blocks):
    """Largest multiple-of-128 divisor of Np (<= _TN_CAP); optionally capped so
    the N axis has >= 2 blocks (lets v7x's second TensorCore participate)."""
    q = Np // 128
    cap = _TN_CAP // 128
    if want_two_blocks and q >= 2:
        cap = min(cap, q // 2)
    for d in range(cap, 0, -1):
        if q % d == 0:
            return d * 128
    return 128


# ----------------------------------------------------------------------------
# Parameter preparation (run once, outside the per-call path)
# ----------------------------------------------------------------------------

def prepare_fc_params(weight, bias, *, matmul_dtype=jnp.bfloat16):
    """Pre-transpose, cast and zero-pad nn.Linear params.

    weight: (out_size, in_size) torch layout   -> wp: (Kp, Np) in matmul_dtype
    bias:   (out_size,)                        -> bp: (1, Np)  float32
    Hoisting this out of fc_forward removes 1-2 weight-sized HBM round trips
    per call (transpose + pad) that the previous version paid every forward.
    """
    N, K = weight.shape
    Kp = K if K <= _TK_CAP else _round_up(K, 512)   # don't pad K for small layers
    Np = _round_up(N, 128)                          # lane-dense output stores
    wp = jnp.pad(weight.T.astype(matmul_dtype), ((0, Kp - K), (0, Np - N)))
    bp = jnp.pad(bias.astype(jnp.float32).reshape(1, N), ((0, 0), (0, Np - N)))
    return wp, bp


# ----------------------------------------------------------------------------
# Kernels
# ----------------------------------------------------------------------------

def _fc_kernel_single(x_ref, w_ref, b_ref, o_ref, *, use_relu):
    """Whole K fits in one tile: dot + bias (+ReLU) straight to the output."""
    y = jnp.dot(x_ref[...], w_ref[...], preferred_element_type=jnp.float32)
    y = y + b_ref[...]
    if use_relu:
        y = jnp.maximum(y, 0.0)
    o_ref[...] = y.astype(o_ref.dtype)


def _fc_kernel_multi(x_ref, w_ref, b_ref, o_ref, acc_ref, *, use_relu):
    """K tiled along grid axis 2 (reduction last) with an f32 accumulator."""
    k = pl.program_id(2)

    @pl.when(k == 0)
    def _():
        acc_ref[...] = jnp.zeros_like(acc_ref)

    acc_ref[...] += jnp.dot(x_ref[...], w_ref[...],
                            preferred_element_type=jnp.float32)

    @pl.when(k == pl.num_programs(2) - 1)
    def _():
        y = acc_ref[...] + b_ref[...]
        if use_relu:
            y = jnp.maximum(y, 0.0)
        o_ref[...] = y.astype(o_ref.dtype)


# ----------------------------------------------------------------------------
# Forward wrapper
# ----------------------------------------------------------------------------

def fc_forward(x, wp, bp, *, out_size, use_relu=True, dropout_r=0.0):
    """FC.forward: ReLU(x @ W^T + b) with prepared params (see prepare_fc_params).

    x: (..., in_size); returns (..., out_size) in x.dtype.
    """
    del dropout_r  # TODO(synk): nn.Dropout is identity at inference; no RNG/masking here.

    Kp, Np = wp.shape
    *lead, K = x.shape
    M = 1
    for d in lead:
        M *= d

    # bf16 (or whatever wp.dtype is) operands into the MXU, f32 accumulation.
    x2d = x.reshape(M, K).astype(wp.dtype)

    sub = _sublane_min(wp.dtype)
    tm = min(_TM_CAP, _round_up(M, sub))
    Mp = _round_up(M, tm)
    tk = Kp if Kp <= _TK_CAP else 512              # Kp is a multiple of 512 when padded
    tn = _pick_tn(Np, want_two_blocks=(Mp // tm) < 2)

    xp = jnp.pad(x2d, ((0, Mp - M), (0, Kp - K)))
    n_k = Kp // tk

    if n_k == 1:
        kernel = functools.partial(_fc_kernel_single, use_relu=use_relu)
        grid = (Mp // tm, Np // tn)
        in_specs = [
            pl.BlockSpec((tm, tk), lambda i, j: (i, 0)),    # x tile
            pl.BlockSpec((tk, tn), lambda i, j: (0, j)),    # W^T tile
            pl.BlockSpec((1, tn), lambda i, j: (0, j)),     # bias tile
        ]
        out_specs = pl.BlockSpec((tm, tn), lambda i, j: (i, j))
        scratch_shapes = []
        dim_sem = ("parallel", "parallel")
    else:
        kernel = functools.partial(_fc_kernel_multi, use_relu=use_relu)
        grid = (Mp // tm, Np // tn, n_k)
        in_specs = [
            pl.BlockSpec((tm, tk), lambda i, j, k: (i, k)),
            pl.BlockSpec((tk, tn), lambda i, j, k: (k, j)),
            pl.BlockSpec((1, tn), lambda i, j, k: (0, j)),
        ]
        out_specs = pl.BlockSpec((tm, tn), lambda i, j, k: (i, j))
        scratch_shapes = [pltpu.VMEM((tm, tn), jnp.float32)]
        dim_sem = ("parallel", "parallel", "arbitrary")

    out = pl.pallas_call(
        kernel,
        out_shape=jax.ShapeDtypeStruct((Mp, Np), x.dtype),
        grid_spec=pltpu.PrefetchScalarGridSpec(
            num_scalar_prefetch=0,
            grid=grid,
            in_specs=in_specs,
            out_specs=out_specs,
            scratch_shapes=scratch_shapes,
        ),
        compiler_params=pltpu.CompilerParams(
            dimension_semantics=dim_sem,
            vmem_limit_bytes=_VMEM_LIMIT_BYTES),
    )(xp, wp, bp)

    return out[:M, :out_size].reshape(*lead, out_size)


# ----------------------------------------------------------------------------
# Main
# ----------------------------------------------------------------------------

if __name__ == "__main__":
    root_key = jax.random.PRNGKey(0)

    def run_case(B, T, in_size, out_size, use_relu=True):
        k = jax.random.fold_in(root_key, in_size)
        kx, kw, kb = jax.random.split(k, 3)
        bound = 1.0 / math.sqrt(in_size)           # PyTorch nn.Linear-style init
        x = jax.random.normal(kx, (B, T, in_size), jnp.float32)
        weight = jax.random.uniform(kw, (out_size, in_size), jnp.float32, -bound, bound)
        bias = jax.random.uniform(kb, (out_size,), jnp.float32, -bound, bound)

        wp, bp = prepare_fc_params(weight, bias)   # once, at parameter-load time
        fwd = jax.jit(functools.partial(fc_forward, out_size=out_size,
                                        use_relu=use_relu))
        y = fwd(x, wp, bp)
        jax.block_until_ready(y)

        y_ref = jnp.einsum("btk,nk->btn", x, weight) + bias
        if use_relu:
            y_ref = jnp.maximum(y_ref, 0.0)
        assert y.shape == (B, T, out_size)
        assert bool(jnp.all(jnp.isfinite(y)))
        # bf16 matmul operands (f32 accumulation) vs. a full-f32 reference.
        assert bool(jnp.allclose(y, y_ref, atol=3e-2, rtol=3e-2))

    # Small FC shapes implied by the module (single-K-step fast path, grid 2D).
    run_case(B=2, T=8, in_size=32, out_size=64, use_relu=True)
    # Larger in_size to exercise the K-tiled accumulator path (grid axis 2).
    run_case(B=2, T=32, in_size=1536, out_size=256, use_relu=True)

    print("KERNEL_OK")
</pallas_src>

<mosaic_0001>
module attributes {stable_mosaic.version = 11 : i64} {
  func.func @_fc_kernel_single(%arg0: i32, %arg1: i32, %arg2: memref<16x32xbf16, #tpu.memory_space<vmem>>, %arg3: memref<32x128xbf16, #tpu.memory_space<vmem>>, %arg4: memref<1x128xf32, #tpu.memory_space<vmem>>, %arg5: memref<16x128xf32, #tpu.memory_space<vmem>>) attributes {dimension_semantics = [#tpu.dimension_semantics<parallel>, #tpu.dimension_semantics<parallel>], iteration_bounds = array<i64: 1, 1>, scalar_prefetch = 0 : i64, scratch_operands = 0 : i64, tpu.core_type = #tpu.core_type<tc>, window_params = [{transform_indices = @transform_0, window_bounds = array<i64: 16, 32>}, {transform_indices = @transform_1, window_bounds = array<i64: 32, 128>}, {transform_indices = @transform_2, window_bounds = array<i64: 1, 128>}, {transform_indices = @transform_3, window_bounds = array<i64: 16, 128>}]} {
    %c0 = arith.constant 0 : index
    %c0_0 = arith.constant 0 : index
    %0 = vector.load %arg2[%c0, %c0_0] : memref<16x32xbf16, #tpu.memory_space<vmem>>, vector<16x32xbf16>
    %c0_1 = arith.constant 0 : index
    %c0_2 = arith.constant 0 : index
    %1 = vector.load %arg3[%c0_1, %c0_2] : memref<32x128xbf16, #tpu.memory_space<vmem>>, vector<32x128xbf16>
    %cst = arith.constant dense<0.000000e+00> : vector<16x128xf32>
    %2 = tpu.matmul %0, %1, %cst {dimension_numbers = #tpu.dot_dimension_numbers<[1], [0], [0], [1], [0, 0, 1, 1], [], []>} : vector<16x32xbf16>, vector<32x128xbf16>, vector<16x128xf32> -> vector<16x128xf32>
    %c0_3 = arith.constant 0 : index
    %c0_4 = arith.constant 0 : index
    %3 = vector.load %arg4[%c0_3, %c0_4] : memref<1x128xf32, #tpu.memory_space<vmem>>, vector<1x128xf32>
    %4 = vector.broadcast %3 : vector<1x128xf32> to vector<16x128xf32>
    %5 = arith.addf %2, %4 : vector<16x128xf32>
    %cst_5 = arith.constant 0.000000e+00 : f32
    %6 = vector.broadcast %cst_5 : f32 to vector<16x128xf32>
    %7 = arith.maximumf %5, %6 : vector<16x128xf32>
    %c0_6 = arith.constant 0 : index
    %c0_7 = arith.constant 0 : index
    %8 = vector.load %arg5[%c0_6, %c0_7] : memref<16x128xf32, #tpu.memory_space<vmem>>, vector<16x128xf32>
    tpu.vector_store %arg5[%c0_6, %c0_7], %7 {strides = array<i32>} : memref<16x128xf32, #tpu.memory_space<vmem>>, vector<16x128xf32>,
    return
  }
  func.func @transform_0(%arg0: i32, %arg1: i32) -> (i32, i32) {
    %c0_i32 = arith.constant 0 : i32
    %c0_i32_0 = arith.constant 0 : i32
    return %arg0, %c0_i32 : i32, i32
  }
  func.func @transform_1(%arg0: i32, %arg1: i32) -> (i32, i32) {
    %c0_i32 = arith.constant 0 : i32
    %c0_i32_0 = arith.constant 0 : i32
    return %c0_i32, %arg1 : i32, i32
  }
  func.func @transform_2(%arg0: i32, %arg1: i32) -> (i32, i32) {
    %c0_i32 = arith.constant 0 : i32
    %c0_i32_0 = arith.constant 0 : i32
    return %c0_i32, %arg1 : i32, i32
  }
  func.func @transform_3(%arg0: i32, %arg1: i32) -> (i32, i32) {
    %c0_i32 = arith.constant 0 : i32
    return %arg0, %arg1 : i32, i32
  }
}

</mosaic_0001>

<bundles_post_ra>
// kernel: fc_forward.1
= control target key start
LH: loop header
LB: loop body
LE: loop exit
PB: predicated region body
PF: predicated region fallthrough
CT: control target
= control target key end

     0   :  { %v119_v0 = vmov 0.0   ;;  %vm120_vm0 = vmmov 0   ;;  %vm45_vm1 = vcmask 261120   ;;  %s159_s1 = inlined_call_operand.vmem [shape: bf16[32,128], index: 1, kind: input, shape index: {}]   ;;  %s160_s0 = inlined_call_operand.vmem [shape: bf16[16,32], index: 0, kind: input, shape index: {}]   ;;  %s161_s2 = inlined_call_operand.vmem [shape: f32[1,128], index: 2, kind: input, shape index: {}]   ;;  %s162_s3 = inlined_call_operand.vmem [shape: f32[16,128], index: 3, kind: output, shape index: {}]  }
   0x1   :  { %106 = vmatprep.subr.bf16.mxu0 %v119_v0  ;;  %v116_v1 = vld [vmem:[%s159_s1] sm:$0xff]   ;;  %110 = vmatprep.mubr.msk.bf16.mxu0 %vm120_vm0, %v119_v0  ;;  %v117_v2 = vld [vmem:[%s159_s1 + $0x8] sm:$0xff]  }
   0x2   :  { %107 = vmatpush3.bf16.msra.mxu0 %v116_v1  ;;  %v118_v3 = vld [vmem:[%s160_s0] sm:$0xff]  }
   0x3   :  { %108 = vmatprep.subr.bf16.mxu0 %v119_v0  ;;  %v98_v4 = vld [vmem:[%s161_s2] ss:$0 sm:$0xff] }
   0x6   :  { %109 = vmatpush3.bf16.msra.mxu0 %v117_v2 }
   0x9   :  { %111 = vmatmul.mubr.msk.bf16.vlgmr.msra.gmra.mrb[0].mxu0 %vm45_vm1, %v118_v3 }
  0xdc   :  { %v83_v5 = vpop.f32.mrb[0].mxu0 }
  0xdd   :  { %v84_v6 = vadd.f32 %v98_v4, %v83_v5  ;;  %v112_v7 = vpop.f32.mrb[1].mxu0 }
  0xde   :  { %v86_v8 = vpop.f32.mrb[2].mxu0 }
  0xdf   :  { %v90_v9 = vmax.f32 %v84_v6, 0.0  ;;  %v87_v10 = vadd.f32 %v98_v4, %v86_v8  ;;  %v113_v11 = vpop.f32.mrb[3].mxu0 }
  0xe1   :  { %92 = vst [vmem:[%s162_s3] sm:$0xff] %v90_v9  ;;  %v91_v12 = vmax.f32 %v87_v10, 0.0 }
  0xe3   :  { %93 = vst [vmem:[%s162_s3 + $0x8] sm:$0xff] %v91_v12 }

</bundles_post_ra>
